<compile_context>
chip_gen: v7x
topology: tpu7x:2x2x1
jax: 0.10.0
libtpu: 0.0.40
codegen_flags: <defaults>
</compile_context>

<pallas_src>
import jax
import jax.numpy as jnp
from jax.experimental import pallas as pl
from jax.experimental.pallas import tpu as pltpu

H1 = 300
H2 = 50
LANE = 128


def _round_up(x, m):
    return (x + m - 1) // m * m


def fc_kernel(x_ref, w1_ref, b1_ref, w2_ref, b2_ref, w3_ref, b3_ref, o_ref):
    # fc1 + ReLU   (bf16 MXU inputs, f32 accumulation; bias/activation in f32)
    x = x_ref[...].astype(jnp.bfloat16)
    h1 = jnp.dot(x, w1_ref[...], preferred_element_type=jnp.float32)
    h1 = jnp.maximum(h1 + b1_ref[...], 0.0)
    # fc2 + sigmoid  (single EUP tanh; avoids exp overflow + reciprocal)
    h2 = jnp.dot(h1.astype(jnp.bfloat16), w2_ref[...],
                 preferred_element_type=jnp.float32)
    z = h2 + b2_ref[...]
    s = 0.5 * jnp.tanh(0.5 * z) + 0.5
    # fc3 (no activation), store at true output width (no 128-pad writeback)
    out = jnp.dot(s.astype(jnp.bfloat16), w3_ref[...],
                  preferred_element_type=jnp.float32)
    o_ref[...] = (out + b3_ref[...]).astype(o_ref.dtype)


def prepare_params(params, input_dim, output_dim):
    """Zero-pad hidden dims to MXU-friendly widths and cast weights to bf16.
    Input and output feature dims stay at their true sizes (full-dim blocks)."""
    h1_p = _round_up(H1, LANE)   # 384
    h2_p = _round_up(H2, LANE)   # 128

    def pad2(a, r, c):
        return jnp.pad(a, ((0, r - a.shape[0]), (0, c - a.shape[1])))

    pp = {
        "w1": pad2(params["w1"], input_dim, h1_p).astype(jnp.bfloat16),
        "b1": pad2(params["b1"], 1, h1_p),
        "w2": pad2(params["w2"], h1_p, h2_p).astype(jnp.bfloat16),
        "b2": pad2(params["b2"], 1, h2_p),
        "w3": pad2(params["w3"], h2_p, output_dim).astype(jnp.bfloat16),
        "b3": params["b3"],
    }
    return pp, (h1_p, h2_p)


def fc_forward(x, params, *, block_m=1024):
    """x: [B, input_dim] float32. params: dict of w1,b1,w2,b2,w3,b3 (f32)."""
    B, input_dim = x.shape
    output_dim = params["w3"].shape[1]
    pp, (h1_p, h2_p) = prepare_params(params, input_dim, output_dim)

    # Batch tile: cap at block_m, round to 16 (bf16 sublane packing).
    bm = min(block_m, _round_up(B, 16))
    # Megacore: for mid-sized batches make sure the grid has >=2 steps so the
    # "parallel" axis shards across two TensorCores on v7x.
    if B >= 64:
        bm = min(bm, _round_up(pl.cdiv(B, 2), 16))
    b_pad = _round_up(B, bm)

    # Only pad the batch dim; keep x f32 (cast to bf16 inside the kernel).
    x_p = x if b_pad == B else jnp.pad(x, ((0, b_pad - B), (0, 0)))

    grid = (b_pad // bm,)
    const2 = lambda i: (0, 0)           # weights/biases resident across steps

    in_specs = [
        pl.BlockSpec((bm, input_dim), lambda i: (i, 0)),  # x: streamed per tile
        pl.BlockSpec((input_dim, h1_p), const2),          # w1
        pl.BlockSpec((1, h1_p), const2),                  # b1
        pl.BlockSpec((h1_p, h2_p), const2),               # w2
        pl.BlockSpec((1, h2_p), const2),                  # b2
        pl.BlockSpec((h2_p, output_dim), const2),         # w3
        pl.BlockSpec((1, output_dim), const2),            # b3
    ]
    out_spec = pl.BlockSpec((bm, output_dim), lambda i: (i, 0))

    flops = 2 * b_pad * (input_dim * h1_p + h1_p * h2_p + h2_p * output_dim)
    bytes_accessed = (
        x_p.size * 4
        + (pp["w1"].size + pp["w2"].size + pp["w3"].size) * 2
        + (pp["b1"].size + pp["b2"].size + pp["b3"].size) * 4
        + b_pad * output_dim * 4
    )
    cost = pl.CostEstimate(flops=flops,
                           transcendentals=b_pad * h2_p,
                           bytes_accessed=bytes_accessed)

    out_p = pl.pallas_call(
        fc_kernel,
        out_shape=jax.ShapeDtypeStruct((b_pad, output_dim), jnp.float32),
        grid=grid,
        in_specs=in_specs,
        out_specs=out_spec,
        compiler_params=pltpu.CompilerParams(
            dimension_semantics=("parallel",),
            vmem_limit_bytes=32 << 20,   # safe margin for large tiles on v5e
        ),
        cost_estimate=cost,
    )(x_p, pp["w1"], pp["b1"], pp["w2"], pp["b2"], pp["w3"], pp["b3"])

    return out_p if b_pad == B else out_p[:B]


def init_params(key, input_dim, output_dim):
    """Mimic torch.nn.Linear default init: U[-1/sqrt(fan_in), +1/sqrt(fan_in)].
    Weights stored as [in_features, out_features] (transpose of torch layout)."""
    ks = jax.random.split(key, 6)

    def lin(kw, kb, fan_in, fan_out):
        bound = 1.0 / jnp.sqrt(jnp.float32(fan_in))
        w = jax.random.uniform(kw, (fan_in, fan_out), jnp.float32, -bound, bound)
        b = jax.random.uniform(kb, (1, fan_out), jnp.float32, -bound, bound)
        return w, b

    w1, b1 = lin(ks[0], ks[1], input_dim, H1)
    w2, b2 = lin(ks[2], ks[3], H1, H2)
    w3, b3 = lin(ks[4], ks[5], H2, output_dim)
    return {"w1": w1, "b1": b1, "w2": w2, "b2": b2, "w3": w3, "b3": b3}


def fc_reference_f32(x, p):
    h1 = jnp.maximum(x @ p["w1"] + p["b1"], 0.0)
    h2 = jax.nn.sigmoid(h1 @ p["w2"] + p["b2"])
    return h2 @ p["w3"] + p["b3"]


def fc_reference_bf16(x, p):
    """Reference mimicking the kernel's bf16 MXU inputs / f32 accumulation."""
    f = lambda a: a.astype(jnp.bfloat16).astype(jnp.float32)
    h1 = jnp.maximum(f(x) @ f(p["w1"]) + p["b1"], 0.0)
    h2 = jax.nn.sigmoid(f(h1) @ f(p["w2"]) + p["b2"])
    return f(h2) @ f(p["w3"]) + p["b3"]


if __name__ == "__main__":
    input_dim = 32
    output_dim = 10

    key = jax.random.PRNGKey(0)
    kx, kp, kx2 = jax.random.split(key, 3)
    params = init_params(kp, input_dim, output_dim)

    # Small-batch path (single grid step, remainder rounding to 16).
    batch = 2
    x = jax.random.normal(kx, (batch, input_dim), jnp.float32)
    out = jax.block_until_ready(fc_forward(x, params))
    assert out.shape == (batch, output_dim)
    ref = fc_reference_bf16(x, params)
    max_err = float(jnp.max(jnp.abs(out - ref)))
    assert jnp.allclose(out, ref, atol=2e-2, rtol=2e-2), max_err

    # Mid-batch path (exercises >=2 grid steps / megacore split + batch pad).
    batch2 = 96
    x2 = jax.random.normal(kx2, (batch2, input_dim), jnp.float32)
    out2 = jax.block_until_ready(fc_forward(x2, params))
    assert out2.shape == (batch2, output_dim)
    ref2 = fc_reference_bf16(x2, params)
    max_err2 = float(jnp.max(jnp.abs(out2 - ref2)))
    assert jnp.allclose(out2, ref2, atol=2e-2, rtol=2e-2), max_err2

    print("KERNEL_OK")
</pallas_src>

<mosaic_0001>
module attributes {stable_mosaic.version = 11 : i64} {
  func.func @fc_kernel(%arg0: i32, %arg1: memref<16x32xf32, #tpu.memory_space<vmem>>, %arg2: memref<32x384xbf16, #tpu.memory_space<vmem>>, %arg3: memref<1x384xf32, #tpu.memory_space<vmem>>, %arg4: memref<384x128xbf16, #tpu.memory_space<vmem>>, %arg5: memref<1x128xf32, #tpu.memory_space<vmem>>, %arg6: memref<128x10xbf16, #tpu.memory_space<vmem>>, %arg7: memref<1x10xf32, #tpu.memory_space<vmem>>, %arg8: memref<16x10xf32, #tpu.memory_space<vmem>>) attributes {dimension_semantics = [#tpu.dimension_semantics<parallel>], iteration_bounds = array<i64: 1>, scalar_prefetch = 0 : i64, scratch_operands = 0 : i64, tpu.core_type = #tpu.core_type<tc>, window_params = [{transform_indices = @transform_0, window_bounds = array<i64: 16, 32>}, {pipeline_mode = #tpu.pipeline_mode<synchronous>, transform_indices = @transform_1, window_bounds = array<i64: 32, 384>}, {pipeline_mode = #tpu.pipeline_mode<synchronous>, transform_indices = @transform_2, window_bounds = array<i64: 1, 384>}, {pipeline_mode = #tpu.pipeline_mode<synchronous>, transform_indices = @transform_3, window_bounds = array<i64: 384, 128>}, {pipeline_mode = #tpu.pipeline_mode<synchronous>, transform_indices = @transform_4, window_bounds = array<i64: 1, 128>}, {pipeline_mode = #tpu.pipeline_mode<synchronous>, transform_indices = @transform_5, window_bounds = array<i64: 128, 10>}, {pipeline_mode = #tpu.pipeline_mode<synchronous>, transform_indices = @transform_6, window_bounds = array<i64: 1, 10>}, {transform_indices = @transform_7, window_bounds = array<i64: 16, 10>}]} {
    %c0 = arith.constant 0 : index
    %c0_0 = arith.constant 0 : index
    %0 = vector.load %arg1[%c0, %c0_0] : memref<16x32xf32, #tpu.memory_space<vmem>>, vector<16x32xf32>
    %1 = arith.truncf %0 : vector<16x32xf32> to vector<16x32xbf16>
    %c0_1 = arith.constant 0 : index
    %c0_2 = arith.constant 0 : index
    %2 = vector.load %arg2[%c0_1, %c0_2] : memref<32x384xbf16, #tpu.memory_space<vmem>>, vector<32x384xbf16>
    %cst = arith.constant dense<0.000000e+00> : vector<16x384xf32>
    %3 = tpu.matmul %1, %2, %cst {dimension_numbers = #tpu.dot_dimension_numbers<[1], [0], [0], [1], [0, 0, 1, 1], [], []>} : vector<16x32xbf16>, vector<32x384xbf16>, vector<16x384xf32> -> vector<16x384xf32>
    %c0_3 = arith.constant 0 : index
    %c0_4 = arith.constant 0 : index
    %4 = vector.load %arg3[%c0_3, %c0_4] : memref<1x384xf32, #tpu.memory_space<vmem>>, vector<1x384xf32>
    %5 = vector.broadcast %4 : vector<1x384xf32> to vector<16x384xf32>
    %6 = arith.addf %3, %5 : vector<16x384xf32>
    %cst_5 = arith.constant 0.000000e+00 : f32
    %7 = vector.broadcast %cst_5 : f32 to vector<16x384xf32>
    %8 = arith.maximumf %6, %7 : vector<16x384xf32>
    %9 = arith.truncf %8 : vector<16x384xf32> to vector<16x384xbf16>
    %c0_6 = arith.constant 0 : index
    %c0_7 = arith.constant 0 : index
    %10 = vector.load %arg4[%c0_6, %c0_7] : memref<384x128xbf16, #tpu.memory_space<vmem>>, vector<384x128xbf16>
    %cst_8 = arith.constant dense<0.000000e+00> : vector<16x128xf32>
    %11 = tpu.matmul %9, %10, %cst_8 {dimension_numbers = #tpu.dot_dimension_numbers<[1], [0], [0], [1], [0, 0, 1, 1], [], []>} : vector<16x384xbf16>, vector<384x128xbf16>, vector<16x128xf32> -> vector<16x128xf32>
    %c0_9 = arith.constant 0 : index
    %c0_10 = arith.constant 0 : index
    %12 = vector.load %arg5[%c0_9, %c0_10] : memref<1x128xf32, #tpu.memory_space<vmem>>, vector<1x128xf32>
    %13 = vector.broadcast %12 : vector<1x128xf32> to vector<16x128xf32>
    %14 = arith.addf %11, %13 : vector<16x128xf32>
    %cst_11 = arith.constant 5.000000e-01 : f32
    %15 = vector.broadcast %cst_11 : f32 to vector<16x128xf32>
    %16 = arith.mulf %15, %14 : vector<16x128xf32>
    %17 = math.tanh %16 : vector<16x128xf32>
    %cst_12 = arith.constant 5.000000e-01 : f32
    %18 = vector.broadcast %cst_12 : f32 to vector<16x128xf32>
    %19 = arith.mulf %18, %17 : vector<16x128xf32>
    %cst_13 = arith.constant 5.000000e-01 : f32
    %20 = vector.broadcast %cst_13 : f32 to vector<16x128xf32>
    %21 = arith.addf %19, %20 : vector<16x128xf32>
    %22 = arith.truncf %21 : vector<16x128xf32> to vector<16x128xbf16>
    %c0_14 = arith.constant 0 : index
    %c0_15 = arith.constant 0 : index
    %23 = vector.load %arg6[%c0_14, %c0_15] : memref<128x10xbf16, #tpu.memory_space<vmem>>, vector<128x10xbf16>
    %cst_16 = arith.constant dense<0.000000e+00> : vector<16x10xf32>
    %24 = tpu.matmul %22, %23, %cst_16 {dimension_numbers = #tpu.dot_dimension_numbers<[1], [0], [0], [1], [0, 0, 1, 1], [], []>} : vector<16x128xbf16>, vector<128x10xbf16>, vector<16x10xf32> -> vector<16x10xf32>
    %c0_17 = arith.constant 0 : index
    %c0_18 = arith.constant 0 : index
    %25 = vector.load %arg7[%c0_17, %c0_18] : memref<1x10xf32, #tpu.memory_space<vmem>>, vector<1x10xf32>
    %26 = vector.broadcast %25 : vector<1x10xf32> to vector<16x10xf32>
    %27 = arith.addf %24, %26 : vector<16x10xf32>
    %c0_19 = arith.constant 0 : index
    %c0_20 = arith.constant 0 : index
    %28 = vector.load %arg8[%c0_19, %c0_20] : memref<16x10xf32, #tpu.memory_space<vmem>>, vector<16x10xf32>
    tpu.vector_store %arg8[%c0_19, %c0_20], %27 {strides = array<i32>} : memref<16x10xf32, #tpu.memory_space<vmem>>, vector<16x10xf32>,
    return
  }
  func.func @transform_0(%arg0: i32) -> (i32, i32) {
    %c0_i32 = arith.constant 0 : i32
    %c0_i32_0 = arith.constant 0 : i32
    return %arg0, %c0_i32 : i32, i32
  }
  func.func @transform_1(%arg0: i32) -> (i32, i32) {
    %c0_i32 = arith.constant 0 : i32
    %c0_i32_0 = arith.constant 0 : i32
    %c0_i32_1 = arith.constant 0 : i32
    return %c0_i32, %c0_i32_0 : i32, i32
  }
  func.func @transform_2(%arg0: i32) -> (i32, i32) {
    %c0_i32 = arith.constant 0 : i32
    %c0_i32_0 = arith.constant 0 : i32
    %c0_i32_1 = arith.constant 0 : i32
    return %c0_i32, %c0_i32_0 : i32, i32
  }
  func.func @transform_3(%arg0: i32) -> (i32, i32) {
    %c0_i32 = arith.constant 0 : i32
    %c0_i32_0 = arith.constant 0 : i32
    %c0_i32_1 = arith.constant 0 : i32
    return %c0_i32, %c0_i32_0 : i32, i32
  }
  func.func @transform_4(%arg0: i32) -> (i32, i32) {
    %c0_i32 = arith.constant 0 : i32
    %c0_i32_0 = arith.constant 0 : i32
    %c0_i32_1 = arith.constant 0 : i32
    return %c0_i32, %c0_i32_0 : i32, i32
  }
  func.func @transform_5(%arg0: i32) -> (i32, i32) {
    %c0_i32 = arith.constant 0 : i32
    %c0_i32_0 = arith.constant 0 : i32
    %c0_i32_1 = arith.constant 0 : i32
    return %c0_i32, %c0_i32_0 : i32, i32
  }
  func.func @transform_6(%arg0: i32) -> (i32, i32) {
    %c0_i32 = arith.constant 0 : i32
    %c0_i32_0 = arith.constant 0 : i32
    %c0_i32_1 = arith.constant 0 : i32
    return %c0_i32, %c0_i32_0 : i32, i32
  }
  func.func @transform_7(%arg0: i32) -> (i32, i32) {
    %c0_i32 = arith.constant 0 : i32
    %c0_i32_0 = arith.constant 0 : i32
    return %arg0, %c0_i32 : i32, i32
  }
}

</mosaic_0001>

<bundles_post_ra>
// kernel: tpu_custom_call.1
= control target key start
LH: loop header
LB: loop body
LE: loop exit
PB: predicated region body
PF: predicated region fallthrough
CT: control target
= control target key end

     0   :  { %12 = vsyncpa [#allocation3], 0  ;;  %s1011_s0 = inlined_call_operand.vmem [shape: f32[16,32], index: 0, kind: input, shape index: {}]   ;;  %s1012_s1 = inlined_call_operand.vmem [shape: bf16[32,384], index: 1, kind: input, shape index: {}]   ;;  %s1013_s2 = inlined_call_operand.vmem [shape: f32[1,384], index: 2, kind: input, shape index: {}]   ;;  %s1014_s3 = inlined_call_operand.hbm [shape: bf16[384,128], index: 3, kind: input, shape index: {}]   ;;  %s1015_s4 = inlined_call_operand.vmem [shape: f32[1,128], index: 4, kind: input, shape index: {}]   ;;  %s1016_s5 = inlined_call_operand.vmem [shape: bf16[128,10], index: 5, kind: input, shape index: {}]   ;;  %s1017_s6 = inlined_call_operand.vmem [shape: f32[1,10], index: 6, kind: input, shape index: {}]   ;;  %s1018_s7 = inlined_call_operand.hbm [shape: f32[16,10], index: 7, kind: output, shape index: {}]  }
   0x1   :  { %13 = vsyncpa [#allocation4], 0  ;;  %s855_s24 = smov [#allocation2]   ;;  %s807_s28 = scalar_lea.hbm %s1014_s3, 3072 }
   0x2   :  { %s25_s25 = sshll.u32 %s855_s24, 4  ;;  %p808_p0 = scmp.ne.s32.totalorder %s1014_s3, %s807_s28  ;;  %s26_s25 = int_to_ptr.vmem [resolvable:$true] %s25_s25 }
   0x3   :  { %p811_p1 = scmp.lt.u32.totalorder %s807_s28, %s1014_s3 }
   0x5   :  { %p813_p2 = pnand %p811_p1, %p808_p0 }
   0x7   :  { %816 = shalt.err (!%p813_p2)
}
   0x8   :  { %s817_s10 = scalar_lea.vmem %s26_s25, 3072  ;;  %p822_p4 = scmp.lt.s32.totalorder %s26_s25, %s26_s25 }
   0x9   :  { %p818_p3 = scmp.ne.s32.totalorder %s26_s25, %s817_s10  ;;  %p823_p5 = scmp.lt.s32.totalorder %s817_s10, %s817_s10 }
   0xb   :  { %p824_p6 = por %p823_p5, %p822_p4 }
   0xd   :  { %p825_p7 = pnand %p824_p6, %p818_p3 }
   0xf   :  { %828 = shalt.err (!%p825_p7)
}
  0x10   :  { %s856_s11 = smov 64   ;;  %s857_s12 = smov 4  }
  0x11   :  { %31 = dma.hbm_to_vmem [thread:$0]  %s1014_s3, 3072, %s26_s25, [#allocation3], %s856_s11, %s856_s11, %s857_s12  }
  0x12   :  { %851 = dma.done.wait [#allocation3], 3072  }
  0x13   :  { %852 = vsyncadd [#allocation3], 4294964224  ;;  %v858_v0 = vmov 0   ;;  %v763_v1 = vld [vmem:[%s1012_s1 + $0x4] ss:$12 sps:$4 sm:$0xff]   ;;  %v43_v6 = vld [vmem:[%s1011_s0 + $0x8] sm:$0xff]  ;;  %v55_v35 = vlaneseq }
  0x14   :  { %138 = vmatprep.mubr.bf16.mxu1 %v858_v0  ;;  %v765_v2 = vld [vmem:[%s1012_s1] ss:$12 sps:$4 sm:$0xff]   ;;  %106 = vmatprep.subr.bf16.mxu1 %v763_v1  ;;  %v766_v3 = vld [vmem:[%s1012_s1 + $0x1c] ss:$12 sps:$4 sm:$0xff]   ;;  %v768_v4 = vld [vmem:[%s1012_s1 + $0x18] ss:$12 sps:$4 sm:$0xff]  }
  0x15   :  { %v42_v5 = vld [vmem:[%s1011_s0] sm:$0xff]  ;;  %107 = vmatpush1.bf16.msra.mxu1 %v765_v2  ;;  %v769_v7 = vld [vmem:[%s1012_s1 + $0x8] ss:$12 sps:$4 sm:$0xff]   ;;  %vm102_vm0 = vcmask 261120   ;;  %v859_v11 = vmov 0.0   ;;  %vm860_vm1 = vmmov 0  }
  0x16   :  { %108 = vmatprep.subr.bf16.mxu1 %v766_v3  ;;  %v44_v8 = vpack.c.bf16 %v43_v6, %v42_v5  ;;  %v771_v9 = vld [vmem:[#allocation2 + $0x40] sm:$0xff]   ;;  %v773_v12 = vld [vmem:[#allocation2 + $0x48] sm:$0xff]   ;;  %v776_v15 = vld [vmem:[#allocation2 + $0x50] sm:$0xff]   ;;  %v56_v36 = vshrl.u32 %v55_v35, 7  ;;  %s861_s23 = smov [#allocation5]   ;;  %vm601_vm2 = vcmask 80896  }
  0x17   :  { %v772_v10 = vld [vmem:[#allocation2] sm:$0xff]   ;;  %666 = vmatprep.subr.bf16.mxu0 %v771_v9  ;;  %v774_v13 = vld [vmem:[#allocation2 + $0x8] sm:$0xff]   ;;  %v777_v16 = vld [vmem:[#allocation2 + $0x10] sm:$0xff]   ;;  %s609_s24 = sshll.u32 %s861_s23, 4  ;;  %s610_s24 = int_to_ptr.vmem [resolvable:$true] %s609_s24 }
  0x18   :  { %667 = vmatpush3.bf16.msra.mxu0 %v772_v10  ;;  %v770_v14 = vld [vmem:[%s1012_s1 + $0x20] ss:$12 sps:$4 sm:$0xff]   ;;  %v779_v17 = vld [vmem:[#allocation2 + $0x58] sm:$0xff]   ;;  %v781_v24 = vld [vmem:[#allocation2 + $0x90] sm:$0xff]   ;;  %v57_v37 = vsub.s32 0, %v56_v36  ;;  %v61_v39 = vsub.s32 1, %v56_v36  ;;  %p834_p9 = scmp.lt.s32.totalorder %s610_s24, %s610_s24 }
  0x19   :  { %109 = vmatpush1.bf16.msra.mxu1 %v768_v4  ;;  %668 = vmatprep.subr.bf16.mxu0 %v773_v12  ;;  %v775_v18 = vld [vmem:[#allocation2 + $0x80] sm:$0xff]   ;;  %v780_v19 = vld [vmem:[#allocation2 + $0x18] sm:$0xff]   ;;  %v778_v21 = vld [vmem:[#allocation2 + $0x88] sm:$0xff]   ;;  %v65_v45 = vsub.s32 2, %v56_v36  ;;  %s829_s25 = scalar_lea.vmem %s610_s24, 256 }
  0x1a   :  { %706 = vmatprep.subr.bf16.mxu1 %v859_v11  ;;  %v782_v20 = vld [vmem:[#allocation2 + $0x60] sm:$0xff]   ;;  %v785_v23 = vld [vmem:[#allocation2 + $0x68] sm:$0xff]   ;;  %v784_v25 = vld [vmem:[#allocation2 + $0x98] sm:$0xff]   ;;  %p830_p8 = scmp.ne.s32.totalorder %s610_s24, %s829_s25  ;;  %p835_p10 = scmp.lt.s32.totalorder %s829_s25, %s829_s25 }
  0x1b   :  { %v783_v22 = vld [vmem:[#allocation2 + $0x20] sm:$0xff]   ;;  %v786_v26 = vld [vmem:[#allocation2 + $0x28] sm:$0xff]   ;;  %v788_v28 = vld [vmem:[#allocation2 + $0x70] sm:$0xff]  }
  0x1c   :  { %627 = vmatmul.mubr.msk.bf16.vlgmr.msra.gmra.mrb[0].mxu1 %vm102_vm0, %v44_v8  ;;  %669 = vmatpush3.bf16.msra.mxu0 %v774_v13  ;;  %v787_v27 = vld [vmem:[#allocation2 + $0xa0] sm:$0xff]   ;;  %v789_v29 = vld [vmem:[#allocation2 + $0x30] sm:$0xff]   ;;  %v790_v30 = vld [vmem:[#allocation2 + $0xa8] sm:$0xff]   ;;  %p836_p11 = por %p835_p10, %p834_p9 }
  0x1d   :  { %707 = vmatpush3.bf16.msra.mxu1 %v769_v7  ;;  %710 = vmatprep.mubr.msk.bf16.mxu1 %vm860_vm1, %v859_v11  ;;  %v791_v31 = vld [vmem:[#allocation2 + $0x78] sm:$0xff]   ;;  %v793_v33 = vld [vmem:[#allocation2 + $0xb0] sm:$0xff]   ;;  %v53_v38 = vld [vmem:[%s1013_s2] sm:$0x7] }
  0x1e   :  { %708 = vmatprep.subr.bf16.mxu1 %v859_v11  ;;  %670 = vmatprep.subr.bf16.mxu0 %v776_v15  ;;  %v792_v32 = vld [vmem:[#allocation2 + $0x38] sm:$0xff]   ;;  %v58_v40 = vrot.slane %v53_v38, %v57_v37  ;;  %v62_v41 = vrot.slane %v53_v38, %v61_v39  ;;  %v66_v53 = vrot.slane %v53_v38, %v65_v45  ;;  %v795_v59 = vld [vmem:[%s1016_s5] sm:$0xff]   ;;  %v796_v4 = vld [vmem:[%s1016_s5 + $0x8] sm:$0xff]   ;;  %p837_p12 = pnand %p836_p11, %p830_p8 }
  0x1f   :  { %v794_v34 = vld [vmem:[#allocation2 + $0xb8] sm:$0xff]   ;;  %v797_v5 = vld [vmem:[%s1016_s5 + $0x10] sm:$0xff]   ;;  %v799_v7 = vld [vmem:[%s1016_s5 + $0x20] sm:$0xff]  }
  0x20   :  { %671 = vmatpush3.bf16.msra.mxu0 %v777_v16  ;;  %v798_v6 = vld [vmem:[%s1016_s5 + $0x18] sm:$0xff]   ;;  %v801_v9 = vld [vmem:[%s1016_s5 + $0x30] sm:$0xff]   ;;  %v654_v35 = vld [vmem:[%s1017_s6] ss:$0 sm:$0xff] }
  0x21   :  { %709 = vmatpush3.bf16.msra.mxu1 %v770_v14  ;;  %672 = vmatprep.subr.bf16.mxu0 %v779_v17  ;;  %v802_v10 = vld [vmem:[%s1016_s5 + $0x38] sm:$0xff]   ;;  %v629_v14 = vld [vmem:[%s1015_s4] ss:$0 sm:$0xff] }
  0x22   :  { %714 = vmatprep.subr.bf16.mxu1 %v859_v11 }
  0x24   :  { %711 = vmatmul.mubr.msk.bf16.vlgmr.msra.gmra.mrb[4].mxu1 %vm102_vm0, %v44_v8  ;;  %673 = vmatpush3.bf16.msra.mxu0 %v780_v19  ;;  %v800_v8 = vld [vmem:[%s1016_s5 + $0x28] sm:$0xff]  }
  0x25   :  { %715 = vmatpush3.bf16.msra.mxu1 %v775_v18  ;;  %730 = vmatprep.mubr.msk.bf16.mxu1 %vm860_vm1, %v859_v11 }
  0x26   :  { %716 = vmatprep.subr.bf16.mxu1 %v859_v11  ;;  %674 = vmatprep.subr.bf16.mxu0 %v782_v20 }
  0x28   :  { %675 = vmatpush3.bf16.msra.mxu0 %v783_v22 }
  0x29   :  { %717 = vmatpush3.bf16.msra.mxu1 %v778_v21  ;;  %676 = vmatprep.subr.bf16.mxu0 %v785_v23 }
  0x2a   :  { %718 = vmatprep.subr.bf16.mxu1 %v859_v11 }
  0x2c   :  { %677 = vmatpush3.bf16.msra.mxu0 %v786_v26 }
  0x2d   :  { %719 = vmatpush3.bf16.msra.mxu1 %v781_v24  ;;  %678 = vmatprep.subr.bf16.mxu0 %v788_v28 }
  0x2e   :  { %720 = vmatprep.subr.bf16.mxu1 %v859_v11 }
  0x30   :  { %679 = vmatpush3.bf16.msra.mxu0 %v789_v29 }
  0x31   :  { %721 = vmatpush3.bf16.msra.mxu1 %v784_v25  ;;  %680 = vmatprep.subr.bf16.mxu0 %v791_v31 }
  0x32   :  { %722 = vmatprep.subr.bf16.mxu1 %v859_v11 }
  0x34   :  { %681 = vmatpush3.bf16.msra.mxu0 %v792_v32 }
  0x35   :  { %723 = vmatpush3.bf16.msra.mxu1 %v787_v27  ;;  %734 = vmatprep.subr.bf16.mxu0 %v859_v11 }
  0x36   :  { %724 = vmatprep.subr.bf16.mxu1 %v859_v11 }
  0x39   :  { %725 = vmatpush3.bf16.msra.mxu1 %v790_v30 }
  0x3a   :  { %726 = vmatprep.subr.bf16.mxu1 %v859_v11 }
  0x3d   :  { %727 = vmatpush3.bf16.msra.mxu1 %v793_v33 }
  0x3e   :  { %728 = vmatprep.subr.bf16.mxu1 %v859_v11 }
  0x41   :  { %729 = vmatpush3.bf16.msra.mxu1 %v794_v34 }
  0xef   :  { %v140_v42 = vpop.f32.mrb[0].mxu1 }
  0xf0   :  { %v141_v43 = vadd.f32 %v140_v42, %v58_v40  ;;  %v142_v44 = vpop.f32.mrb[1].mxu1 }
  0xf1   :  { %v143_v46 = vadd.f32 %v142_v44, %v62_v41  ;;  %v144_v47 = vpop.f32.mrb[2].mxu1 }
  0xf2   :  { %v145_v48 = vadd.f32 %v144_v47, %v58_v40  ;;  %v146_v49 = vpop.f32.mrb[3].mxu1  ;;  %v190_v51 = vmax.f32 %v141_v43, 0.0 }
  0xf3   :  { %v147_v50 = vadd.f32 %v146_v49, %v62_v41  ;;  %v191_v54 = vmax.f32 %v143_v46, 0.0 }
  0xf4   :  { %v193_v52 = vmax.f32 %v145_v48, 0.0 }
  0xf5   :  { %v194_v55 = vmax.f32 %v147_v50, 0.0 }
  0xf6   :  { %v196_v56 = vpack.c.bf16 %v193_v52, %v190_v51 }
  0xf7   :  { %v183_v57 = vpop.f32.mrb[4].mxu1  ;;  %v197_v58 = vpack.c.bf16 %v194_v55, %v191_v54 }
  0xf8   :  { %v184_v60 = vadd.f32 %v183_v57, %v66_v53  ;;  %v712_v61 = vpop.f32.mrb[5].mxu1 }
  0xf9   :  { %v186_v62 = vpop.f32.mrb[6].mxu1  ;;  %430 = vmatprep.mubr.bf16.mxu0 %v197_v58 }
  0xfa   :  { %v187_v63 = vadd.f32 %v186_v62, %v66_v53  ;;  %v713_v0 = vpop.f32.mrb[7].mxu1  ;;  %431 = vmatmul.mubr.bf16.vlgmr.msra.gmra.mrb[0].mxu0 %v196_v56  ;;  %v192_v1 = vmax.f32 %v184_v60, 0.0 }
  0xfb   :  { %735 = vmatpush3.bf16.msra.mxu0 %v795_v59  ;;  %750 = vmatprep.mubr.msk.bf16.mxu0 %vm860_vm1, %v859_v11 }
  0xfc   :  { %v195_v2 = vmax.f32 %v187_v63, 0.0  ;;  %736 = vmatprep.subr.bf16.mxu0 %v859_v11 }
  0xfe   :  { %v198_v3 = vpack.c.bf16 %v195_v2, %v192_v1 }
  0xff   :  { %737 = vmatpush3.bf16.msra.mxu0 %v796_v4 }
 0x100   :  { %731 = vmatmul.mubr.bf16.vlgmr.msra.gmra.mrb[8].mxu1 %v198_v3  ;;  %738 = vmatprep.subr.bf16.mxu0 %v859_v11 }
 0x103   :  { %739 = vmatpush3.bf16.msra.mxu0 %v797_v5 }
 0x104   :  { %740 = vmatprep.subr.bf16.mxu0 %v859_v11 }
 0x107   :  { %741 = vmatpush3.bf16.msra.mxu0 %v798_v6 }
 0x108   :  { %742 = vmatprep.subr.bf16.mxu0 %v859_v11 }
 0x10b   :  { %743 = vmatpush3.bf16.msra.mxu0 %v799_v7 }
 0x10c   :  { %744 = vmatprep.subr.bf16.mxu0 %v859_v11 }
 0x10f   :  { %745 = vmatpush3.bf16.msra.mxu0 %v800_v8 }
 0x110   :  { %746 = vmatprep.subr.bf16.mxu0 %v859_v11 }
 0x113   :  { %747 = vmatpush3.bf16.msra.mxu0 %v801_v9 }
 0x114   :  { %748 = vmatprep.subr.bf16.mxu0 %v859_v11 }
 0x117   :  { %749 = vmatpush3.bf16.msra.mxu0 %v802_v10 }
 0x1cd   :  { %v682_v12 = vpop.f32.mrb[0].mxu0 }
 0x1ce   :  { %v683_v13 = vpop.f32.mrb[1].mxu0 }
 0x1cf   :  { %v684_v15 = vadd.f32 %v683_v13, %v682_v12  ;;  %v685_v16 = vpop.f32.mrb[2].mxu0 }
 0x1d0   :  { %v686_v17 = vpop.f32.mrb[3].mxu0 }
 0x1d1   :  { %v687_v18 = vadd.f32 %v686_v17, %v685_v16  ;;  %v433_v19 = vadd.f32 %v684_v15, %v629_v14 }
 0x1d3   :  { %v473_v20 = vpop.f32.mrb[8].mxu1  ;;  %v436_v21 = vadd.f32 %v687_v18, %v629_v14 }
 0x1d4   :  { %v474_v22 = vadd.f32 %v473_v20, %v433_v19  ;;  %v732_v11 = vpop.f32.mrb[9].mxu1 }
 0x1d5   :  { %v476_v23 = vpop.f32.mrb[10].mxu1 }
 0x1d6   :  { %v480_v24 = vmul.f32 0.5, %v474_v22  ;;  %v477_v25 = vadd.f32 %v476_v23, %v436_v21  ;;  %v733_v26 = vpop.f32.mrb[11].mxu1 }
 0x1d8   :  { %803 = vtanh.f32 %v480_v24  ;;  %v481_v27 = vmul.f32 0.5, %v477_v25 }
 0x1da   :  { %805 = vtanh.f32 %v481_v27 }
 0x1e2   :  { %v804_v28 = vpop.eup %803 }
 0x1e3   :  { %v484_v29 = vmul.f32 0.5, %v804_v28 }
 0x1e4   :  { %v806_v30 = vpop.eup %805 }
 0x1e5   :  { %v485_v31 = vmul.f32 0.5, %v806_v30  ;;  %v486_v32 = vadd.f32 0.5, %v484_v29 }
 0x1e7   :  { %v487_v33 = vadd.f32 0.5, %v485_v31 }
 0x1e9   :  { %v488_v34 = vpack.c.bf16 %v487_v33, %v486_v32 }
 0x1eb   :  { %751 = vmatmul.mubr.bf16.vlgmr.msra.gmra.mrb[4].mxu0 %v488_v34 }
 0x2be   :  { %v594_v36 = vpop.f32.mrb[4].mxu0 }
 0x2bf   :  { %v595_v37 = vadd.f32 %v654_v35, %v594_v36  ;;  %v752_v38 = vpop.f32.mrb[5].mxu0 }
 0x2c0   :  { %v597_v39 = vpop.f32.mrb[6].mxu0 }
 0x2c1   :  { %602 = vst.msk [vmem:[#allocation5] sm:$0xff] %vm601_vm2, %v595_v37  ;;  %v598_v40 = vadd.f32 %v654_v35, %v597_v39  ;;  %v753_v41 = vpop.f32.mrb[7].mxu0 }
 0x2c3   :  { %603 = vst.msk [vmem:[#allocation5 + $0x8] sm:$0xff] %vm601_vm2, %v598_v40 }
 0x2c4   :  { %840 = shalt.err (!%p837_p12)
}
 0x2c5   :  { %s841_s27 = scalar_lea.hbm %s1018_s7, 256 }
 0x2c6   :  { %p842_p13 = scmp.ne.s32.totalorder %s1018_s7, %s841_s27  ;;  %p845_p0 = scmp.lt.u32.totalorder %s841_s27, %s1018_s7 }
 0x2c8   :  { %p847_p1 = pnand %p845_p0, %p842_p13 }
 0x2ca   :  { %850 = shalt.err (!%p847_p1)
}
 0x2cb   :  { %s862_s2 = smov 128   ;;  %s863_s30 = smov 8  }
 0x2cc   :  { %615 = dma.vmem_to_hbm [thread:$0]  %s610_s24, 256, %s1018_s7, [#allocation4], %s862_s2, %s862_s2, %s863_s30  }
 0x2cd   :  { %853 = dma.done.wait [#allocation4], 256  }
 0x2ce   :  { %854 = vsyncadd [#allocation4], 4294967040 }
 0x2cf   :  { %619 = vsyncpa [#allocation3], 1 }
 0x2d0   :  { %620 = vsyncpa [#allocation4], 1 }

</bundles_post_ra>
